<compile_context>
chip_gen: v7x
topology: tpu7x:2x2x1
jax: 0.10.0
libtpu: 0.0.40
codegen_flags: <defaults>
</compile_context>

<pallas_src>
import jax
import jax.numpy as jnp
from jax.experimental import pallas as pl
from jax.experimental.pallas import tpu as pltpu


def _priority_mlp_kernel(x_ref, w1_ref, b1_ref, w2_ref, b2_ref, o_ref):
    # Layer 1: (tile, D_in) @ (D_in, H) -- bf16 operands, single MXU pass,
    # f32 accumulation.  astype is a no-op if x is already streamed as bf16.
    x_bf16 = x_ref[...].astype(jnp.bfloat16)
    h = jnp.dot(x_bf16, w1_ref[...], preferred_element_type=jnp.float32)
    h = jnp.maximum(h + b1_ref[...], 0.0)              # bias + ReLU on the VPU
    # Layer 2: (tile, H) @ (H, 1) on the MXU (bf16 operands, f32 accumulate)
    # instead of a VPU multiply + XLU lane reduction.
    out = jnp.dot(h.astype(jnp.bfloat16), w2_ref[...],
                  preferred_element_type=jnp.float32)
    o_ref[...] = (out + b2_ref[0, 0]).astype(o_ref.dtype)   # b2: SMEM scalar


def _round_up(x, m):
    return ((x + m - 1) // m) * m


def priority_network_forward(x, w1, b1, w2, b2, *, tile_b=4096):
    """Forward pass of PriorityNetwork.

    x : (B, D_in) float32 (or bfloat16 to halve the dominant HBM stream)
    w1: (D_in, H), b1: (H,) or (1, H)
    w2: (H, 1) or (H,), b2: scalar-like ((1,), (1, 1), ...)
    returns (B, 1) float32.
    """
    x = jnp.asarray(x)
    if x.dtype != jnp.bfloat16:
        x = x.astype(jnp.float32)
    B, D_in = x.shape
    H = w1.shape[1]
    assert w1.shape == (D_in, H)

    # Params: weights in bf16 for single-pass MXU matmuls; biases stay f32.
    w1 = jnp.asarray(w1, jnp.bfloat16)
    b1 = jnp.asarray(b1, jnp.float32).reshape(1, H)
    w2 = jnp.asarray(w2, jnp.bfloat16).reshape(H, 1)
    b2 = jnp.asarray(b2, jnp.float32).reshape(1, 1)

    # Batch tile: multiple of 8 sublanes, at most tile_b (VMEM cap: the
    # lane-padded (tile,22)/(tile,1) blocks cost tile*512 B each), and small
    # enough to keep >= 4 grid steps when B allows it so both v7x TensorCores
    # get work and the double-buffered x stream overlaps DMA with compute.
    tile = min(int(tile_b), max(8, pl.cdiv(B, 4)))
    tile = max(8, _round_up(tile, 8))
    grid = (pl.cdiv(B, tile),)   # ragged last block; no jnp.pad copy of x

    out = pl.pallas_call(
        _priority_mlp_kernel,
        out_shape=jax.ShapeDtypeStruct((B, 1), jnp.float32),
        grid=grid,
        in_specs=[
            pl.BlockSpec((tile, D_in), lambda i: (i, 0)),   # x streamed per tile
            pl.BlockSpec((D_in, H), lambda i: (0, 0)),      # VMEM-resident w1
            pl.BlockSpec((1, H), lambda i: (0, 0)),         # b1 row
            pl.BlockSpec((H, 1), lambda i: (0, 0)),         # w2 column
            pl.BlockSpec(memory_space=pltpu.MemorySpace.SMEM),  # b2 scalar
        ],
        out_specs=pl.BlockSpec((tile, 1), lambda i: (i, 0)),
        compiler_params=pltpu.CompilerParams(
            dimension_semantics=("parallel",),
            vmem_limit_bytes=32 * 1024 * 1024),
    )(x, w1, b1, w2, b2)
    return out


def init_params(key, state_dim, action_dim, hidden=128):
    """PyTorch-style uniform(-1/sqrt(fan_in), 1/sqrt(fan_in)) init (biases 1-D)."""
    d_in = state_dim + action_dim + 1 + state_dim + 1
    k1, k2, k3, k4 = jax.random.split(key, 4)
    bound1 = 1.0 / float(d_in) ** 0.5
    bound2 = 1.0 / float(hidden) ** 0.5
    w1 = jax.random.uniform(k1, (d_in, hidden), jnp.float32, -bound1, bound1)
    b1 = jax.random.uniform(k2, (hidden,), jnp.float32, -bound1, bound1)
    w2 = jax.random.uniform(k3, (hidden, 1), jnp.float32, -bound2, bound2)
    b2 = jax.random.uniform(k4, (1,), jnp.float32, -bound2, bound2)
    return w1, b1, w2, b2


if __name__ == "__main__":
    state_dim, action_dim = 8, 4                 # D_in = 8 + 4 + 1 + 8 + 1 = 22
    d_in = state_dim + action_dim + 1 + state_dim + 1
    hidden = 128

    key = jax.random.PRNGKey(0)
    k_params, k_x1, k_x2 = jax.random.split(key, 3)
    w1, b1, w2, b2 = init_params(k_params, state_dim, action_dim, hidden)

    def ref_forward_f32(x):
        h = jnp.maximum(x @ w1 + b1[None, :], 0.0)
        return h @ w2 + b2[None, :]

    def ref_forward_bf16(x):
        # Emulates the kernel's bf16-operand / f32-accumulate MXU arithmetic.
        h = jnp.dot(x.astype(jnp.bfloat16), w1.astype(jnp.bfloat16),
                    preferred_element_type=jnp.float32)
        h = jnp.maximum(h + b1[None, :], 0.0)
        return jnp.dot(h.astype(jnp.bfloat16), w2.astype(jnp.bfloat16),
                       preferred_element_type=jnp.float32) + b2[None, :]

    # Small, single-block case (grid = 1).
    x_small = jax.random.normal(k_x1, (8, d_in), jnp.float32)
    out_small = jax.block_until_ready(
        priority_network_forward(x_small, w1, b1, w2, b2))
    assert out_small.shape == (8, 1)
    assert jnp.allclose(out_small, ref_forward_bf16(x_small), atol=1e-3, rtol=1e-3)
    assert jnp.allclose(out_small, ref_forward_f32(x_small), atol=5e-2, rtol=5e-2)

    # Multi-block case exercising the batch grid + a ragged last block
    # (200 rows -> tile 56, grid 4, last block has 32 valid rows, no pad copy).
    x_multi = jax.random.normal(k_x2, (200, d_in), jnp.float32)
    out_multi = jax.block_until_ready(
        priority_network_forward(x_multi, w1, b1, w2, b2, tile_b=64))
    assert out_multi.shape == (200, 1)
    assert jnp.allclose(out_multi, ref_forward_bf16(x_multi), atol=1e-3, rtol=1e-3)
    assert jnp.allclose(out_multi, ref_forward_f32(x_multi), atol=5e-2, rtol=5e-2)

    print("KERNEL_OK")
</pallas_src>

<mosaic_0001>
module attributes {stable_mosaic.version = 11 : i64} {
  func.func @_priority_mlp_kernel(%arg0: i32, %arg1: memref<8x22xf32, #tpu.memory_space<vmem>>, %arg2: memref<22x128xbf16, #tpu.memory_space<vmem>>, %arg3: memref<1x128xf32, #tpu.memory_space<vmem>>, %arg4: memref<128x1xbf16, #tpu.memory_space<vmem>>, %arg5: memref<1x1xf32, #tpu.memory_space<smem>>, %arg6: memref<8x1xf32, #tpu.memory_space<vmem>>) attributes {dimension_semantics = [#tpu.dimension_semantics<parallel>], iteration_bounds = array<i64: 1>, scalar_prefetch = 0 : i64, scratch_operands = 0 : i64, tpu.core_type = #tpu.core_type<tc>, window_params = [{transform_indices = @transform_0, window_bounds = array<i64: 8, 22>}, {pipeline_mode = #tpu.pipeline_mode<synchronous>, transform_indices = @transform_1, window_bounds = array<i64: 22, 128>}, {pipeline_mode = #tpu.pipeline_mode<synchronous>, transform_indices = @transform_2, window_bounds = array<i64: 1, 128>}, {pipeline_mode = #tpu.pipeline_mode<synchronous>, transform_indices = @transform_3, window_bounds = array<i64: 128, 1>}, {transform_indices = @transform_4, window_bounds = array<i64: 1, 1>}, {transform_indices = @transform_5, window_bounds = array<i64: 8, 1>}]} {
    %c0 = arith.constant 0 : index
    %c0_0 = arith.constant 0 : index
    %0 = vector.load %arg1[%c0, %c0_0] : memref<8x22xf32, #tpu.memory_space<vmem>>, vector<8x22xf32>
    %1 = arith.truncf %0 : vector<8x22xf32> to vector<8x22xbf16>
    %c0_1 = arith.constant 0 : index
    %c0_2 = arith.constant 0 : index
    %2 = vector.load %arg2[%c0_1, %c0_2] : memref<22x128xbf16, #tpu.memory_space<vmem>>, vector<22x128xbf16>
    %cst = arith.constant dense<0.000000e+00> : vector<8x128xf32>
    %3 = tpu.matmul %1, %2, %cst {dimension_numbers = #tpu.dot_dimension_numbers<[1], [0], [0], [1], [0, 0, 1, 1], [], []>} : vector<8x22xbf16>, vector<22x128xbf16>, vector<8x128xf32> -> vector<8x128xf32>
    %c0_3 = arith.constant 0 : index
    %c0_4 = arith.constant 0 : index
    %4 = vector.load %arg3[%c0_3, %c0_4] : memref<1x128xf32, #tpu.memory_space<vmem>>, vector<1x128xf32>
    %5 = vector.broadcast %4 : vector<1x128xf32> to vector<8x128xf32>
    %6 = arith.addf %3, %5 : vector<8x128xf32>
    %cst_5 = arith.constant 0.000000e+00 : f32
    %7 = vector.broadcast %cst_5 : f32 to vector<8x128xf32>
    %8 = arith.maximumf %6, %7 : vector<8x128xf32>
    %9 = arith.truncf %8 : vector<8x128xf32> to vector<8x128xbf16>
    %c0_6 = arith.constant 0 : index
    %c0_7 = arith.constant 0 : index
    %10 = vector.load %arg4[%c0_6, %c0_7] : memref<128x1xbf16, #tpu.memory_space<vmem>>, vector<128x1xbf16>
    %cst_8 = arith.constant dense<0.000000e+00> : vector<8x1xf32>
    %11 = tpu.matmul %9, %10, %cst_8 {dimension_numbers = #tpu.dot_dimension_numbers<[1], [0], [0], [1], [0, 0, 1, 1], [], []>} : vector<8x128xbf16>, vector<128x1xbf16>, vector<8x1xf32> -> vector<8x1xf32>
    %c0_9 = arith.constant 0 : index
    %c0_10 = arith.constant 0 : index
    %12 = memref.load %arg5[%c0_9, %c0_10] : memref<1x1xf32, #tpu.memory_space<smem>>
    %13 = vector.broadcast %12 : f32 to vector<8x1xf32>
    %14 = arith.addf %11, %13 : vector<8x1xf32>
    %c0_11 = arith.constant 0 : index
    %c0_12 = arith.constant 0 : index
    %15 = vector.load %arg6[%c0_11, %c0_12] : memref<8x1xf32, #tpu.memory_space<vmem>>, vector<8x1xf32>
    tpu.vector_store %arg6[%c0_11, %c0_12], %14 {strides = array<i32>} : memref<8x1xf32, #tpu.memory_space<vmem>>, vector<8x1xf32>,
    return
  }
  func.func @transform_0(%arg0: i32) -> (i32, i32) {
    %c0_i32 = arith.constant 0 : i32
    %c0_i32_0 = arith.constant 0 : i32
    return %arg0, %c0_i32 : i32, i32
  }
  func.func @transform_1(%arg0: i32) -> (i32, i32) {
    %c0_i32 = arith.constant 0 : i32
    %c0_i32_0 = arith.constant 0 : i32
    %c0_i32_1 = arith.constant 0 : i32
    return %c0_i32, %c0_i32_0 : i32, i32
  }
  func.func @transform_2(%arg0: i32) -> (i32, i32) {
    %c0_i32 = arith.constant 0 : i32
    %c0_i32_0 = arith.constant 0 : i32
    %c0_i32_1 = arith.constant 0 : i32
    return %c0_i32, %c0_i32_0 : i32, i32
  }
  func.func @transform_3(%arg0: i32) -> (i32, i32) {
    %c0_i32 = arith.constant 0 : i32
    %c0_i32_0 = arith.constant 0 : i32
    %c0_i32_1 = arith.constant 0 : i32
    return %c0_i32, %c0_i32_0 : i32, i32
  }
  func.func @transform_4(%arg0: i32) -> (i32, i32) {
    %c0_i32 = arith.constant 0 : i32
    %c0_i32_0 = arith.constant 0 : i32
    %c0_i32_1 = arith.constant 0 : i32
    return %c0_i32, %c0_i32_0 : i32, i32
  }
  func.func @transform_5(%arg0: i32) -> (i32, i32) {
    %c0_i32 = arith.constant 0 : i32
    %c0_i32_0 = arith.constant 0 : i32
    return %arg0, %c0_i32 : i32, i32
  }
}

</mosaic_0001>

<bundles_post_ra>
// kernel: tpu_custom_call.1
= control target key start
LH: loop header
LB: loop body
LE: loop exit
PB: predicated region body
PF: predicated region fallthrough
CT: control target
= control target key end

     0   :  { %v269_v0 = vmov 0.0   ;;  %vm47_vm0 = vcmask 1042432   ;;  %vm270_vm1 = vmmov 0   ;;  %vm43_vm2 = vcmask 179200   ;;  %s343_s1 = inlined_call_operand.vmem [shape: bf16[22,128], index: 1, kind: input, shape index: {}]   ;;  %s344_s0 = inlined_call_operand.vmem [shape: f32[8,22], index: 0, kind: input, shape index: {}]   ;;  %s345_s3 = inlined_call_operand.vmem [shape: bf16[128,1], index: 3, kind: input, shape index: {}]   ;;  %s346_s2 = inlined_call_operand.vmem [shape: f32[1,128], index: 2, kind: input, shape index: {}]   ;;  %s347_s4 = inlined_call_operand.<no memory space> [shape: f32[1,1], index: 4, kind: input, shape index: {}]   ;;  %s348_s5 = inlined_call_operand.vmem [shape: f32[8,1], index: 5, kind: output, shape index: {}]  }
   0x1   :  { %229 = vmatprep.subr.bf16.mxu0 %v269_v0  ;;  %v259_v1 = vld [vmem:[%s343_s1] sm:$0xff]   ;;  %233 = vmatprep.mubr.msk.bf16.mxu0 %vm270_vm1, %v269_v0  ;;  %v260_v2 = vld [vmem:[%s343_s1 + $0x8] ss:$0 sps:$4 sm:$0x77]   ;;  %v263_v8 = vld [vmem:[%s345_s3 + $0x10] sm:$0xff]   ;;  %v110_v22 = vstv %s347_s4  ;;  %vm199_vm3 = vcmask 7168  }
   0x2   :  { %v22_v3 = vld [vmem:[%s344_s0] sm:$0xff]  ;;  %237 = vmatprep.subr.bf16.mxu1 %v269_v0  ;;  %253 = vmatprep.mubr.msk.bf16.mxu1 %vm270_vm1, %v269_v0  ;;  %v49_v5 = vsel %vm47_vm0, %v260_v2, 0  ;;  %v262_v6 = vld [vmem:[%s345_s3 + $0x8] sm:$0xff]   ;;  %v264_v9 = vld [vmem:[%s345_s3 + $0x18] sm:$0xff]  }
   0x3   :  { %230 = vmatpush3.bf16.msra.mxu0 %v259_v1  ;;  %v261_v4 = vld [vmem:[%s345_s3] sm:$0xff]   ;;  %v23_v7 = vpack.c.bf16 %v22_v3, %v22_v3  ;;  %v266_v11 = vld [vmem:[%s345_s3 + $0x28] sm:$0xff]   ;;  %v267_v12 = vld [vmem:[%s345_s3 + $0x30] sm:$0xff]  }
   0x4   :  { %231 = vmatprep.subr.bf16.mxu0 %v269_v0  ;;  %238 = vmatpush3.bf16.msra.mxu1 %v261_v4  ;;  %v265_v10 = vld [vmem:[%s345_s3 + $0x20] sm:$0xff]   ;;  %v268_v13 = vld [vmem:[%s345_s3 + $0x38] sm:$0xff]  }
   0x5   :  { %239 = vmatprep.subr.bf16.mxu1 %v269_v0  ;;  %v205_v14 = vld [vmem:[%s346_s2] ss:$0 sm:$0xff] }
   0x7   :  { %232 = vmatpush3.bf16.msra.mxu0 %v49_v5 }
   0x8   :  { %240 = vmatpush3.bf16.msra.mxu1 %v262_v6 }
   0x9   :  { %241 = vmatprep.subr.bf16.mxu1 %v269_v0 }
   0xa   :  { %234 = vmatmul.mubr.msk.bf16.vlgmr.msra.gmra.mrb[0].mxu0 %vm43_vm2, %v23_v7 }
   0xc   :  { %242 = vmatpush3.bf16.msra.mxu1 %v263_v8 }
   0xd   :  { %243 = vmatprep.subr.bf16.mxu1 %v269_v0 }
  0x10   :  { %244 = vmatpush3.bf16.msra.mxu1 %v264_v9 }
  0x11   :  { %245 = vmatprep.subr.bf16.mxu1 %v269_v0 }
  0x14   :  { %246 = vmatpush3.bf16.msra.mxu1 %v265_v10 }
  0x15   :  { %247 = vmatprep.subr.bf16.mxu1 %v269_v0 }
  0x18   :  { %248 = vmatpush3.bf16.msra.mxu1 %v266_v11 }
  0x19   :  { %249 = vmatprep.subr.bf16.mxu1 %v269_v0 }
  0x1c   :  { %250 = vmatpush3.bf16.msra.mxu1 %v267_v12 }
  0x1d   :  { %251 = vmatprep.subr.bf16.mxu1 %v269_v0 }
  0x20   :  { %252 = vmatpush3.bf16.msra.mxu1 %v268_v13 }
  0xdd   :  { %v85_v15 = vpop.f32.mrb[0].mxu0 }
  0xde   :  { %v86_v16 = vadd.f32 %v205_v14, %v85_v15  ;;  %v235_v17 = vpop.f32.mrb[1].mxu0 }
  0xdf   :  { %v88_v18 = vpop.f32.mrb[2].mxu0 }
  0xe0   :  { %v91_v19 = vmax.f32 %v86_v16, 0.0  ;;  %v236_v20 = vpop.f32.mrb[3].mxu0 }
  0xe2   :  { %v92_v21 = vpack.c.bf16 %v91_v19, %v91_v19 }
  0xe4   :  { %254 = vmatmul.mubr.bf16.vlgmr.msra.gmra.mrb[0].mxu1 %v92_v21 }
 0x1b7   :  { %v193_v23 = vpop.f32.mrb[0].mxu1 }
 0x1b8   :  { %v194_v24 = vadd.f32 %v193_v23, %v110_v22  ;;  %v255_v25 = vpop.f32.mrb[1].mxu1 }
 0x1b9   :  { %v196_v26 = vpop.f32.mrb[2].mxu1 }
 0x1ba   :  { %200 = vst.msk [vmem:[%s348_s5] sm:$0xff] %vm199_vm3, %v194_v24  ;;  %v256_v27 = vpop.f32.mrb[3].mxu1 }

</bundles_post_ra>
